<compile_context>
chip_gen: v5e
topology: v5e:2x2
jax: 0.10.0
libtpu: 0.0.40
codegen_flags: <defaults>
</compile_context>

<pallas_src>
import functools

import jax
import jax.numpy as jnp
from jax.experimental import pallas as pl
from jax.experimental.pallas import tpu as pltpu


def _round_up(n, m):
    return ((n + m - 1) // m) * m


def _cdiv(a, b):
    return -(-a // b)


def _vmem_capacity_bytes():
    """Physical per-core VMEM; falls back to 128 MiB if the query fails."""
    try:
        return int(pltpu.get_tpu_info().vmem_capacity_bytes)
    except Exception:
        return 128 * 1024 * 1024


def _default_tk(vmem_cap):
    # Smaller dff slabs on 64 MiB-VMEM parts (v7x); 256 still feeds the
    # 2x256^2 MXU at full contraction width. 512 on 128 MiB parts.
    return 256 if vmem_cap <= 64 * 1024 * 1024 else 512


def _pick_tiles(M, Dp, Fp, cd_size, out_size, vmem_cap):
    """Pick (TM, TK) so the double-buffered working set fits VMEM while TM is
    large enough to amortize the per-token-tile W1/W2 re-stream from HBM."""
    TK = min(_default_tk(vmem_cap), Fp)
    budget = int(vmem_cap * 0.70)                 # headroom for compiler scratch
    target_tm = 512 if vmem_cap <= 64 * 1024 * 1024 else 1024
    TM = min(target_tm, _round_up(M, 8))

    def usage(tm):
        return (2 * tm * Dp * cd_size             # x blocks (double buffered)
                + 2 * Dp * TK * cd_size           # w1 slabs
                + 2 * TK * Dp * cd_size           # w2 slabs
                + 2 * tm * Dp * out_size          # output blocks
                + tm * Dp * 4)                    # resident f32 accumulator

    while TM > 8 and usage(TM) > budget:
        TM = max(8, _round_up(TM // 2, 8))

    # Megacore (v7x): the "parallel" i-axis is sharded across 2 TensorCores —
    # prefer an even token-tile count when it doesn't wreck intensity.
    n_tiles = _cdiv(M, TM)
    if n_tiles > 1 and n_tiles % 2 == 1:
        tm_even = _round_up(_cdiv(M, n_tiles + 1), 8)
        if tm_even >= 256:
            TM = tm_even
    return TM, TK


def prepare_ffn_params(w1, b1, w2, b2, *, compute_dtype=jnp.bfloat16):
    """One-time pad + cast of the FFN weights (hoisted out of the hot path).

    w1: (d_model, dff), b1: (dff,), w2: (dff, d_model), b2: (d_model,).
    Returns lane-dense compute_dtype weights and f32 row-vector biases.
    Zero padding preserves semantics: padded x cols / w1 rows contribute 0,
    padded b1 entries are 0 so relu(0)=0, padded dff rows of w2 contribute 0,
    and padded output columns are sliced off in the wrapper.
    """
    d_model, dff = w1.shape
    vmem_cap = _vmem_capacity_bytes()
    tk = min(_default_tk(vmem_cap), _round_up(dff, 128))
    Dp = _round_up(d_model, 128)
    Fp = _round_up(dff, tk)
    w1p = jnp.pad(jnp.asarray(w1, compute_dtype),
                  ((0, Dp - d_model), (0, Fp - dff)))
    w2p = jnp.pad(jnp.asarray(w2, compute_dtype),
                  ((0, Fp - dff), (0, Dp - d_model)))
    b1p = jnp.pad(jnp.asarray(b1, jnp.float32), (0, Fp - dff)).reshape(1, Fp)
    b2p = jnp.pad(jnp.asarray(b2, jnp.float32), (0, Dp - d_model)).reshape(1, Dp)
    return w1p, b1p, w2p, b2p


def _ffn_kernel(x_ref, w1_ref, b1_ref, w2_ref, b2_ref, o_ref, acc_ref):
    """One (token tile, dff slab) step of the fused FFN."""
    k = pl.program_id(1)

    @pl.when(k == 0)
    def _():
        acc_ref[...] = jnp.zeros_like(acc_ref)

    # fc1 slab on the MXU (bf16 in, f32 accumulate); bias + ReLU in f32 (VPU).
    h = jnp.dot(x_ref[...], w1_ref[...], preferred_element_type=jnp.float32)
    h = jnp.maximum(h + b1_ref[...], 0.0)

    # fc2 slab, accumulated into the resident f32 scratch accumulator.
    acc_ref[...] += jnp.dot(h.astype(w2_ref.dtype), w2_ref[...],
                            preferred_element_type=jnp.float32)

    @pl.when(k == pl.num_programs(1) - 1)
    def _():
        o_ref[...] = (acc_ref[...] + b2_ref[...]).astype(o_ref.dtype)


@functools.partial(jax.jit, static_argnames=("compute_dtype",))
def feed_forward_prepared(x, w1p, b1p, w2p, b2p, *,
                          compute_dtype=jnp.bfloat16):
    """x: (B, S, d_model); weights pre-padded/cast by prepare_ffn_params.
    Returns (B, S, d_model) in x.dtype."""
    B, S, d_model = x.shape
    Dp, Fp = w1p.shape
    assert Dp == _round_up(d_model, 128) and Dp % 128 == 0 and Fp % 128 == 0
    out_dtype = x.dtype
    M = B * S

    cd_size = jnp.dtype(compute_dtype).itemsize
    out_size = jnp.dtype(out_dtype).itemsize
    vmem_cap = _vmem_capacity_bytes()
    TM, TK = _pick_tiles(M, Dp, Fp, cd_size, out_size, vmem_cap)
    Mp = _round_up(M, TM)
    grid = (Mp // TM, Fp // TK)

    # Only the activation is padded/cast per call; weights were prepared once.
    x2 = jnp.pad(x.reshape(M, d_model).astype(compute_dtype),
                 ((0, Mp - M), (0, Dp - d_model)))

    # Real HBM traffic: weights re-streamed once per token tile.
    n_token_tiles = grid[0]
    cost = pl.CostEstimate(
        flops=4 * M * Dp * Fp,  # two matmuls x 2*M*Dp*Fp
        transcendentals=0,
        bytes_accessed=(n_token_tiles * (w1p.size + w2p.size) * cd_size
                        + x2.size * cd_size + Mp * Dp * out_size),
    )

    # Derive the VMEM limit from the chip (e.g. ~108 MiB on 128 MiB parts,
    # ~54 MiB on v7x's 64 MiB VMEM) instead of hardcoding 64 MiB.
    vmem_limit = max(32 * 1024 * 1024,
                     min(vmem_cap - 8 * 1024 * 1024, int(vmem_cap * 0.85)))

    out = pl.pallas_call(
        _ffn_kernel,
        out_shape=jax.ShapeDtypeStruct((Mp, Dp), out_dtype),
        grid_spec=pltpu.PrefetchScalarGridSpec(
            num_scalar_prefetch=0,
            grid=grid,
            in_specs=[
                pl.BlockSpec((TM, Dp), lambda i, k: (i, 0)),   # x (k-invariant)
                pl.BlockSpec((Dp, TK), lambda i, k: (0, k)),   # w1 dff-slab
                pl.BlockSpec((1, TK), lambda i, k: (0, k)),    # b1 dff-slab
                pl.BlockSpec((TK, Dp), lambda i, k: (k, 0)),   # w2 dff-slab
                pl.BlockSpec((1, Dp), lambda i, k: (0, 0)),    # b2
            ],
            out_specs=pl.BlockSpec((TM, Dp), lambda i, k: (i, 0)),
            scratch_shapes=[pltpu.VMEM((TM, Dp), jnp.float32)],  # f32 acc
        ),
        compiler_params=pltpu.CompilerParams(
            dimension_semantics=("parallel", "arbitrary"),
            vmem_limit_bytes=int(vmem_limit),
        ),
        cost_estimate=cost,
    )(x2, w1p, b1p, w2p, b2p)

    return out[:M, :d_model].reshape(B, S, d_model)


def feed_forward(x, w1, b1, w2, b2, *, compute_dtype=jnp.bfloat16):
    """Convenience wrapper. For repeated calls with the same weights, call
    prepare_ffn_params once and use feed_forward_prepared directly."""
    params = prepare_ffn_params(w1, b1, w2, b2, compute_dtype=compute_dtype)
    return feed_forward_prepared(x, *params, compute_dtype=compute_dtype)


if __name__ == "__main__":
    key = jax.random.PRNGKey(0)
    B, S, d_model, dff = 2, 8, 32, 64

    kx, k1, k2, k3, k4 = jax.random.split(key, 5)
    # Deterministic init mimicking PyTorch nn.Linear (uniform +-1/sqrt(fan_in)).
    lim1 = 1.0 / jnp.sqrt(jnp.float32(d_model))
    lim2 = 1.0 / jnp.sqrt(jnp.float32(dff))
    x = jax.random.normal(kx, (B, S, d_model), jnp.float32)
    w1 = jax.random.uniform(k1, (d_model, dff), jnp.float32, -lim1, lim1)
    b1 = jax.random.uniform(k2, (dff,), jnp.float32, -lim1, lim1)
    w2 = jax.random.uniform(k3, (dff, d_model), jnp.float32, -lim2, lim2)
    b2 = jax.random.uniform(k4, (d_model,), jnp.float32, -lim2, lim2)

    # One-time weight prep (padding + bf16 cast) hoisted out of the hot path.
    params = prepare_ffn_params(w1, b1, w2, b2)
    y = feed_forward_prepared(x, *params)
    jax.block_until_ready(y)

    # Pure-JAX f32 reference; bf16 MXU operands => loosened tolerance.
    ref = jnp.maximum(x @ w1 + b1, 0.0) @ w2 + b2
    assert y.shape == (B, S, d_model)
    max_err = float(jnp.max(jnp.abs(y - ref)))
    assert jnp.allclose(y, ref, atol=2e-2, rtol=2e-2), max_err

    print("KERNEL_OK")
</pallas_src>

<mosaic_0001>
module attributes {stable_mosaic.version = 11 : i64} {
  func.func @_ffn_kernel(%arg0: i32, %arg1: i32, %arg2: memref<16x128xbf16, #tpu.memory_space<vmem>>, %arg3: memref<128x128xbf16, #tpu.memory_space<vmem>>, %arg4: memref<1x128xf32, #tpu.memory_space<vmem>>, %arg5: memref<128x128xbf16, #tpu.memory_space<vmem>>, %arg6: memref<1x128xf32, #tpu.memory_space<vmem>>, %arg7: memref<16x128xf32, #tpu.memory_space<vmem>>, %arg8: memref<16x128xf32, #tpu.memory_space<vmem>>) attributes {dimension_semantics = [#tpu.dimension_semantics<parallel>, #tpu.dimension_semantics<arbitrary>], iteration_bounds = array<i64: 1, 1>, scalar_prefetch = 0 : i64, scratch_operands = 1 : i64, tpu.core_type = #tpu.core_type<tc>, window_params = [{transform_indices = @transform_0, window_bounds = array<i64: 16, 128>}, {transform_indices = @transform_1, window_bounds = array<i64: 128, 128>}, {transform_indices = @transform_2, window_bounds = array<i64: 1, 128>}, {transform_indices = @transform_3, window_bounds = array<i64: 128, 128>}, {pipeline_mode = #tpu.pipeline_mode<synchronous>, transform_indices = @transform_4, window_bounds = array<i64: 1, 128>}, {transform_indices = @transform_5, window_bounds = array<i64: 16, 128>}]} {
    %c0_i32 = arith.constant 0 : i32
    %0 = arith.cmpi eq, %arg1, %c0_i32 : i32
    %1 = arith.extui %0 : i1 to i32
    %c0_i32_0 = arith.constant 0 : i32
    %2 = arith.cmpi ne, %1, %c0_i32_0 : i32
    scf.if %2 {
      %cst_16 = arith.constant 0.000000e+00 : f32
      %20 = vector.broadcast %cst_16 : f32 to vector<16x128xf32>
      %c0_17 = arith.constant 0 : index
      %c0_18 = arith.constant 0 : index
      %21 = vector.load %arg8[%c0_17, %c0_18] : memref<16x128xf32, #tpu.memory_space<vmem>>, vector<16x128xf32>
      tpu.vector_store %arg8[%c0_17, %c0_18], %20 {strides = array<i32>} : memref<16x128xf32, #tpu.memory_space<vmem>>, vector<16x128xf32>,
    } else {
    }
    %c0 = arith.constant 0 : index
    %c0_1 = arith.constant 0 : index
    %3 = vector.load %arg2[%c0, %c0_1] : memref<16x128xbf16, #tpu.memory_space<vmem>>, vector<16x128xbf16>
    %c0_2 = arith.constant 0 : index
    %c0_3 = arith.constant 0 : index
    %4 = vector.load %arg3[%c0_2, %c0_3] : memref<128x128xbf16, #tpu.memory_space<vmem>>, vector<128x128xbf16>
    %cst = arith.constant dense<0.000000e+00> : vector<16x128xf32>
    %5 = tpu.matmul %3, %4, %cst {dimension_numbers = #tpu.dot_dimension_numbers<[1], [0], [0], [1], [0, 0, 1, 1], [], []>} : vector<16x128xbf16>, vector<128x128xbf16>, vector<16x128xf32> -> vector<16x128xf32>
    %c0_4 = arith.constant 0 : index
    %c0_5 = arith.constant 0 : index
    %6 = vector.load %arg4[%c0_4, %c0_5] : memref<1x128xf32, #tpu.memory_space<vmem>>, vector<1x128xf32>
    %7 = vector.broadcast %6 : vector<1x128xf32> to vector<16x128xf32>
    %8 = arith.addf %5, %7 : vector<16x128xf32>
    %cst_6 = arith.constant 0.000000e+00 : f32
    %9 = vector.broadcast %cst_6 : f32 to vector<16x128xf32>
    %10 = arith.maximumf %8, %9 : vector<16x128xf32>
    %c0_7 = arith.constant 0 : index
    %c0_8 = arith.constant 0 : index
    %11 = vector.load %arg8[%c0_7, %c0_8] : memref<16x128xf32, #tpu.memory_space<vmem>>, vector<16x128xf32>
    %12 = arith.truncf %10 : vector<16x128xf32> to vector<16x128xbf16>
    %c0_9 = arith.constant 0 : index
    %c0_10 = arith.constant 0 : index
    %13 = vector.load %arg5[%c0_9, %c0_10] : memref<128x128xbf16, #tpu.memory_space<vmem>>, vector<128x128xbf16>
    %cst_11 = arith.constant dense<0.000000e+00> : vector<16x128xf32>
    %14 = tpu.matmul %12, %13, %cst_11 {dimension_numbers = #tpu.dot_dimension_numbers<[1], [0], [0], [1], [0, 0, 1, 1], [], []>} : vector<16x128xbf16>, vector<128x128xbf16>, vector<16x128xf32> -> vector<16x128xf32>
    %15 = arith.addf %11, %14 : vector<16x128xf32>
    %c0_12 = arith.constant 0 : index
    %c0_13 = arith.constant 0 : index
    %16 = vector.load %arg8[%c0_12, %c0_13] : memref<16x128xf32, #tpu.memory_space<vmem>>, vector<16x128xf32>
    tpu.vector_store %arg8[%c0_12, %c0_13], %15 {strides = array<i32>} : memref<16x128xf32, #tpu.memory_space<vmem>>, vector<16x128xf32>,
    %c0_i32_14 = arith.constant 0 : i32
    %17 = arith.cmpi eq, %arg1, %c0_i32_14 : i32
    %18 = arith.extui %17 : i1 to i32
    %c0_i32_15 = arith.constant 0 : i32
    %19 = arith.cmpi ne, %18, %c0_i32_15 : i32
    scf.if %19 {
      %c0_16 = arith.constant 0 : index
      %c0_17 = arith.constant 0 : index
      %20 = vector.load %arg8[%c0_16, %c0_17] : memref<16x128xf32, #tpu.memory_space<vmem>>, vector<16x128xf32>
      %c0_18 = arith.constant 0 : index
      %c0_19 = arith.constant 0 : index
      %21 = vector.load %arg6[%c0_18, %c0_19] : memref<1x128xf32, #tpu.memory_space<vmem>>, vector<1x128xf32>
      %22 = vector.broadcast %21 : vector<1x128xf32> to vector<16x128xf32>
      %23 = arith.addf %20, %22 : vector<16x128xf32>
      %c0_20 = arith.constant 0 : index
      %c0_21 = arith.constant 0 : index
      %24 = vector.load %arg7[%c0_20, %c0_21] : memref<16x128xf32, #tpu.memory_space<vmem>>, vector<16x128xf32>
      tpu.vector_store %arg7[%c0_20, %c0_21], %23 {strides = array<i32>} : memref<16x128xf32, #tpu.memory_space<vmem>>, vector<16x128xf32>,
    } else {
    }
    return
  }
  func.func @transform_0(%arg0: i32, %arg1: i32) -> (i32, i32) {
    %c0_i32 = arith.constant 0 : i32
    %c0_i32_0 = arith.constant 0 : i32
    return %arg0, %c0_i32 : i32, i32
  }
  func.func @transform_1(%arg0: i32, %arg1: i32) -> (i32, i32) {
    %c0_i32 = arith.constant 0 : i32
    %c0_i32_0 = arith.constant 0 : i32
    return %c0_i32, %arg1 : i32, i32
  }
  func.func @transform_2(%arg0: i32, %arg1: i32) -> (i32, i32) {
    %c0_i32 = arith.constant 0 : i32
    %c0_i32_0 = arith.constant 0 : i32
    return %c0_i32, %arg1 : i32, i32
  }
  func.func @transform_3(%arg0: i32, %arg1: i32) -> (i32, i32) {
    %c0_i32 = arith.constant 0 : i32
    %c0_i32_0 = arith.constant 0 : i32
    return %arg1, %c0_i32 : i32, i32
  }
  func.func @transform_4(%arg0: i32, %arg1: i32) -> (i32, i32) {
    %c0_i32 = arith.constant 0 : i32
    %c0_i32_0 = arith.constant 0 : i32
    %c0_i32_1 = arith.constant 0 : i32
    return %c0_i32, %c0_i32_0 : i32, i32
  }
  func.func @transform_5(%arg0: i32, %arg1: i32) -> (i32, i32) {
    %c0_i32 = arith.constant 0 : i32
    %c0_i32_0 = arith.constant 0 : i32
    return %arg0, %c0_i32 : i32, i32
  }
}

</mosaic_0001>

<bundles_post_ra>
// kernel: feed_forward_prepared.1
= control target key start
LH: loop header
LB: loop body
LE: loop exit
PB: predicated region body
PF: predicated region fallthrough
CT: control target
= control target key end

     0   :  { %10 = vsyncpa [#allocation4], 0  ;;  %s452_s0 = inlined_call_operand.vmem [shape: bf16[16,128], index: 0, kind: input, shape index: {}]   ;;  %s453_s1 = inlined_call_operand.hbm [shape: bf16[128,128], index: 1, kind: input, shape index: {}]   ;;  %s454_s2 = inlined_call_operand.vmem [shape: f32[1,128], index: 2, kind: input, shape index: {}]   ;;  %s455_s3 = inlined_call_operand.hbm [shape: bf16[128,128], index: 3, kind: input, shape index: {}]   ;;  %s456_s4 = inlined_call_operand.vmem [shape: f32[1,128], index: 4, kind: input, shape index: {}]   ;;  %s457_s5 = inlined_call_operand.vmem [shape: f32[16,128], index: 5, kind: output, shape index: {}]  }
   0x1   :  { %s18_s20 = sshll.u32 %s453_s1, 4  ;;  %s19_s20 = int_to_ptr.hbm [resolvable:$true] %s18_s20 }
   0x2   :  { %11 = vsyncpa [#allocation6], 0  ;;  %s397_s21 = smov [#allocation3]   ;;  %s33_s25 = sshll.u32 %s455_s3, 4  ;;  %s34_s25 = int_to_ptr.hbm [resolvable:$true] %s33_s25 }
   0x3   :  { %s20_s22 = sshll.u32 %s397_s21, 4  ;;  %s398_s26 = smov 64   ;;  %s21_s22 = int_to_ptr.vmem [resolvable:$true] %s20_s22 }
   0x4   :  { %s399_s27 = smov 4   ;;  %s400_s28 = smov [#allocation5]  }
   0x5   :  { %26 = dma.hbm_to_vmem [thread:$0]  %s19_s20, 1024, %s21_s22, [#allocation4], %s398_s26, %s398_s26, %s399_s27  }
   0x6   :  { %s35_s29 = sshll.u32 %s400_s28, 4  ;;  %s36_s29 = int_to_ptr.vmem [resolvable:$true] %s35_s29 }
   0x7   :  { %41 = dma.hbm_to_vmem [thread:$0]  %s34_s25, 1024, %s36_s29, [#allocation6], %s398_s26, %s398_s26, %s399_s27  }
   0x8   :  { %393 = dma.done.wait [#allocation4], 1024  }
   0x9   :  { %394 = vsyncadd [#allocation4], 4294966272 }
   0xa   :  { %395 = dma.done.wait [#allocation6], 1024  }
   0xb   :  { %396 = vsyncadd [#allocation6], 4294966272  ;;  %v330_v0 = vld [vmem:[#allocation3 + $0x38] sm:$0xff]  ;;  %v329_v1 = vld [vmem:[#allocation3 + $0x30] sm:$0xff] }
   0xc   :  { %134 = vmatpush.bf16.msra.mxu0 %v330_v0  ;;  %v338_v2 = vld [vmem:[#allocation5 + $0x38] sm:$0xff]  ;;  %v337_v3 = vld [vmem:[#allocation5 + $0x30] sm:$0xff]  ;;  %v328_v4 = vld [vmem:[#allocation3 + $0x28] sm:$0xff] }
   0xd   :  { %217 = vmatpush.bf16.msra.mxu1 %v338_v2  ;;  %v336_v5 = vld [vmem:[#allocation5 + $0x28] sm:$0xff]  ;;  %v327_v6 = vld [vmem:[#allocation3 + $0x20] sm:$0xff]  ;;  %v326_v8 = vld [vmem:[#allocation3 + $0x18] sm:$0xff] }
   0xe   :  { %v335_v7 = vld [vmem:[#allocation5 + $0x20] sm:$0xff]  ;;  %v325_v9 = vld [vmem:[#allocation3 + $0x10] sm:$0xff]  ;;  %v324_v10 = vld [vmem:[#allocation3 + $0x8] sm:$0xff] }
   0xf   :  { %v323_v11 = vld [vmem:[#allocation3] sm:$0xff]  ;;  %v334_v13 = vld [vmem:[#allocation5 + $0x18] sm:$0xff]  ;;  %v333_v14 = vld [vmem:[#allocation5 + $0x10] sm:$0xff] }
  0x10   :  { %135 = vmatpush.bf16.msra.mxu0 %v329_v1  ;;  %v322_v12 = vld [vmem:[%s452_s0] sm:$0xff]  ;;  %v332_v15 = vld [vmem:[#allocation5 + $0x8] sm:$0xff] }
  0x11   :  { %218 = vmatpush.bf16.msra.mxu1 %v337_v3  ;;  %v331_v16 = vld [vmem:[#allocation5] sm:$0xff] }
  0x12   :  { %v343_v18 = vld [vmem:[%s454_s2] ss:$0 sm:$0xff] }
  0x13   :  { %v344_v25 = vld [vmem:[%s456_s4] ss:$0 sm:$0xff] }
  0x14   :  { %136 = vmatpush.bf16.msra.mxu0 %v328_v4 }
  0x15   :  { %219 = vmatpush.bf16.msra.mxu1 %v336_v5 }
  0x18   :  { %137 = vmatpush.bf16.msra.mxu0 %v327_v6 }
  0x19   :  { %220 = vmatpush.bf16.msra.mxu1 %v335_v7 }
  0x1c   :  { %138 = vmatpush.bf16.msra.mxu0 %v326_v8 }
  0x1d   :  { %221 = vmatpush.bf16.msra.mxu1 %v334_v13 }
  0x20   :  { %139 = vmatpush.bf16.msra.mxu0 %v325_v9 }
  0x21   :  { %222 = vmatpush.bf16.msra.mxu1 %v333_v14 }
  0x24   :  { %140 = vmatpush.bf16.msra.mxu0 %v324_v10 }
  0x25   :  { %223 = vmatpush.bf16.msra.mxu1 %v332_v15 }
  0x28   :  { %141 = vmatpush.bf16.msra.mxu0 %v323_v11 }
  0x29   :  { %224 = vmatpush.bf16.msra.mxu1 %v331_v16 }
  0x2b   :  { %142 = vmatmul.bf16.vlgmr.msra.gmra.mxu0 %v322_v12 }
  0xa8   :  { %v143_v17 = vpop.f32.mrf.mxu0 }
  0xa9   :  { %v144_v19 = vadd.f32 %v343_v18, %v143_v17 }
  0xab   :  { %v148_v22 = vmax.f32 %v144_v19, 0.0 }
  0xb0   :  { %v145_v20 = vpop.f32.mrf.mxu0 }
  0xb1   :  { %v146_v21 = vadd.f32 %v343_v18, %v145_v20 }
  0xb3   :  { %v149_v23 = vmax.f32 %v146_v21, 0.0 }
  0xb5   :  { %v152_v24 = vpack.c.bf16 %v149_v23, %v148_v22 }
  0xb7   :  { %225 = vmatmul.bf16.vlgmr.msra.gmra.mxu1 %v152_v24 }
 0x134   :  { %v226_v26 = vpop.f32.mrf.mxu1 }
 0x135   :  { %v244_v27 = vadd.f32 %v344_v25, %v226_v26 }
 0x137   :  { %246 = vst [vmem:[%s457_s5] sm:$0xff] %v244_v27 }
 0x13c   :  { %v228_v28 = vpop.f32.mrf.mxu1 }
 0x13d   :  { %v245_v29 = vadd.f32 %v344_v25, %v228_v28 }
 0x13f   :  { %247 = vst [vmem:[%s457_s5 + $0x8] sm:$0xff] %v245_v29 }
 0x140   :  { %252 = vsyncpa [#allocation4], 1 }
 0x141   :  { %253 = vsyncpa [#allocation6], 1 }

</bundles_post_ra>
